<compile_context>
chip_gen: v5e
topology: v5e:2x2
jax: 0.10.0
libtpu: 0.0.40
codegen_flags: <defaults>
</compile_context>

<pallas_src>
import jax
import jax.numpy as jnp
from jax.experimental import pallas as pl
from jax.experimental.pallas import tpu as pltpu

_LANE = 128
_SUBLANE = 8
_TILE_BYTE_BUDGET = 4 << 20           # ~4 MiB per (tile_rows, 128) tile
_SINGLE_BLOCK_MAX_BYTES = 512 << 10   # single-block only for tiny inputs
_TILED_VMEM_LIMIT_BYTES = 32 << 20    # 4 MiB * (in+out) * 2 buffers = 16 MiB << 32 MiB


def _neg_kernel(x_ref, o_ref):
    # Elementwise hot path: negate the whole VMEM tile on the VPU.
    o_ref[...] = -x_ref[...]


def _round_up(x: int, m: int) -> int:
    return ((x + m - 1) // m) * m


def _cost_estimate(n_elems: int, nbytes: int) -> pl.CostEstimate:
    return pl.CostEstimate(flops=n_elems, transcendentals=0, bytes_accessed=2 * nbytes)


def _neg_single_block(x2d: jax.Array) -> jax.Array:
    """Whole array as one VMEM block: no grid, no pipeline bookkeeping."""
    return pl.pallas_call(
        _neg_kernel,
        out_shape=jax.ShapeDtypeStruct(x2d.shape, x2d.dtype),
        in_specs=[pl.BlockSpec(memory_space=pltpu.MemorySpace.VMEM)],
        out_specs=pl.BlockSpec(memory_space=pltpu.MemorySpace.VMEM),
        cost_estimate=_cost_estimate(x2d.size, x2d.size * x2d.dtype.itemsize),
    )(x2d)


def _neg_tiled(x2d: jax.Array) -> jax.Array:
    """Large inputs: stream ~4 MiB (tile_rows, 128) blocks, auto double-buffered."""
    rows, lane = x2d.shape
    itemsize = x2d.dtype.itemsize

    # Tile rows from a byte budget, rounded to the 8-row sublane granule.
    budget_rows = max(_SUBLANE, (_TILE_BYTE_BUDGET // (lane * itemsize)) // _SUBLANE * _SUBLANE)
    # Guarantee >= 2 grid steps for medium inputs so v7x can use both TensorCores.
    half_rows = _round_up((rows + 1) // 2, _SUBLANE)
    tile_rows = max(_SUBLANE, min(budget_rows, half_rows, rows))

    grid = (pl.cdiv(rows, tile_rows),)
    return pl.pallas_call(
        _neg_kernel,
        out_shape=jax.ShapeDtypeStruct((rows, lane), x2d.dtype),
        grid=grid,
        in_specs=[pl.BlockSpec((tile_rows, lane), lambda i: (i, 0))],
        out_specs=pl.BlockSpec((tile_rows, lane), lambda i: (i, 0)),
        compiler_params=pltpu.CompilerParams(
            dimension_semantics=("parallel",),
            vmem_limit_bytes=_TILED_VMEM_LIMIT_BYTES,
        ),
        cost_estimate=_cost_estimate(rows * lane, rows * lane * itemsize),
    )(x2d)


def simple_dynamics(xs: jax.Array) -> jax.Array:
    """Pallas equivalent of SimpleDynamics.forward(xs) = -xs."""
    orig_shape = xs.shape
    n_elems = xs.size
    if n_elems == 0:
        return xs

    flat = xs.reshape(-1)
    pad = (-n_elems) % _LANE
    if pad:
        # Ragged element count: pad once so every row is a full 128-lane vector
        # (unmasked stores), slice back afterwards. Not hit by the test shape.
        flat = jnp.pad(flat, (0, pad))

    x2d = flat.reshape(-1, _LANE)
    nbytes = x2d.size * x2d.dtype.itemsize

    if nbytes <= _SINGLE_BLOCK_MAX_BYTES:
        out2d = _neg_single_block(x2d)
    else:
        out2d = _neg_tiled(x2d)

    out = out2d.reshape(-1)
    if pad:
        out = out[:n_elems]
    return out.reshape(orig_shape)


if __name__ == "__main__":
    key = jax.random.PRNGKey(0)
    # NCHW, matching PyTorch convention (batch=2, channels=4, spatial=16x16).
    xs = jax.random.normal(key, (2, 4, 16, 16), dtype=jnp.float32)

    dxs = simple_dynamics(xs)
    dxs = jax.block_until_ready(dxs)

    # Correctness check against the trivial reference.
    expected = -xs
    assert dxs.shape == xs.shape and dxs.dtype == xs.dtype
    assert jnp.allclose(dxs, expected), "mismatch vs reference -xs"

    print("KERNEL_OK")
</pallas_src>

<mosaic_0001>
module attributes {stable_mosaic.version = 11 : i64} {
  func.func @_neg_kernel(%arg0: memref<16x128xf32, #tpu.memory_space<vmem>>, %arg1: memref<16x128xf32, #tpu.memory_space<vmem>>) attributes {dimension_semantics = [], scalar_prefetch = 0 : i64, scratch_operands = 0 : i64, tpu.core_type = #tpu.core_type<tc>} {
    %c0 = arith.constant 0 : index
    %c0_0 = arith.constant 0 : index
    %0 = vector.load %arg0[%c0, %c0_0] : memref<16x128xf32, #tpu.memory_space<vmem>>, vector<16x128xf32>
    %cst = arith.constant 0.000000e+00 : f32
    %1 = vector.broadcast %cst : f32 to vector<16x128xf32>
    %2 = arith.subf %1, %0 : vector<16x128xf32>
    %c0_1 = arith.constant 0 : index
    %c0_2 = arith.constant 0 : index
    %3 = vector.load %arg1[%c0_1, %c0_2] : memref<16x128xf32, #tpu.memory_space<vmem>>, vector<16x128xf32>
    tpu.vector_store %arg1[%c0_1, %c0_2], %2 {strides = array<i32>} : memref<16x128xf32, #tpu.memory_space<vmem>>, vector<16x128xf32>,
    return
  }
}

</mosaic_0001>

<bundles_post_ra>
// kernel: tpu_custom_call.1
= control target key start
LH: loop header
LB: loop body
LE: loop exit
PB: predicated region body
PF: predicated region fallthrough
CT: control target
= control target key end

     0   :  { %6 = vsyncpa [#allocation3], 0  ;;  %s126_s0 = inlined_call_operand.hbm [shape: f32[16,128], index: 0, kind: input, shape index: {}]   ;;  %s127_s1 = inlined_call_operand.hbm [shape: f32[16,128], index: 1, kind: output, shape index: {}]  }
   0x1   :  { %7 = vsyncpa [#allocation4], 0  ;;  %s12_s8 = sshll.u32 %s126_s0, 4  ;;  %s106_s9 = smov [#allocation2]   ;;  %s13_s8 = int_to_ptr.hbm [resolvable:$true] %s12_s8 }
   0x2   :  { %s14_s10 = sshll.u32 %s106_s9, 4  ;;  %s107_s11 = smov 128   ;;  %s15_s10 = int_to_ptr.vmem [resolvable:$true] %s14_s10 }
   0x3   :  { %s108_s12 = smov 8  }
   0x4   :  { %20 = dma.hbm_to_vmem [thread:$0]  %s13_s8, 256, %s15_s10, [#allocation3], %s107_s11, %s107_s11, %s108_s12  }
   0x5   :  { %102 = dma.done.wait [#allocation3], 256  }
   0x6   :  { %103 = vsyncadd [#allocation3], 4294967040  ;;  %s109_s13 = smov [#allocation5]   ;;  %s37_s17 = sshll.u32 %s127_s1, 4  ;;  %v25_v0 = vld [vmem:[#allocation2] sm:$0xff]  ;;  %v26_v1 = vld [vmem:[#allocation2 + $0x8] sm:$0xff]  ;;  %s38_s17 = int_to_ptr.hbm [resolvable:$true] %s37_s17 }
   0x7   :  { %s35_s14 = sshll.u32 %s109_s13, 4  ;;  %v27_v2 = vsub.f32 0.0, %v25_v0  ;;  %v28_v3 = vsub.f32 0.0, %v26_v1  ;;  %s36_s14 = int_to_ptr.vmem [resolvable:$true] %s35_s14 }
   0x9   :  { %29 = vst [vmem:[#allocation5] sm:$0xff] %v27_v2 }
   0xa   :  { %30 = vst [vmem:[#allocation5 + $0x8] sm:$0xff] %v28_v3 }
   0xb   :  { %43 = dma.vmem_to_hbm [thread:$0]  %s36_s14, 256, %s38_s17, [#allocation4], %s107_s11, %s107_s11, %s108_s12  }
   0xc   :  { %104 = dma.done.wait [#allocation4], 256  }
   0xd   :  { %105 = vsyncadd [#allocation4], 4294967040 }
   0xe   :  { %48 = vsyncpa [#allocation3], 1 }
   0xf   :  { %49 = vsyncpa [#allocation4], 1 }

</bundles_post_ra>
